<compile_context>
chip_gen: v7x
topology: tpu7x:2x2x1
jax: 0.10.0
libtpu: 0.0.40
codegen_flags: <defaults>
</compile_context>

<pallas_src>
import jax
import jax.numpy as jnp
from jax import lax
from jax.experimental import pallas as pl
from jax.experimental.pallas import tpu as pltpu

D_IN = 768
D_HID = 32


def _cdiv(a, b):
    return (a + b - 1) // b


def _round_up(n, m):
    return ((n + m - 1) // m) * m


def _ae_kernel(x_ref, w1_ref, b1_ref, w2_ref, b2_ref, o_ref):
    # x tile: (tb, 768); w1: (32, 768) native torch layout (lane-dense).
    x = x_ref[...]

    # Encoder: contract the 768 feature dims of x and w1 -> (tb, 32), f32 on the MXU.
    h = lax.dot_general(
        x, w1_ref[...],
        dimension_numbers=(((1,), (1,)), ((), ())),
        preferred_element_type=jnp.float32,
        precision=lax.Precision.HIGHEST,
    )
    h = jnp.maximum(h + b1_ref[...], 0.0)

    # Decoder: (tb, 32) @ (32, 768) + (1, 768) -> lane-dense output tile.
    y = jnp.dot(
        h, w2_ref[...],
        preferred_element_type=jnp.float32,
        precision=lax.Precision.HIGHEST,
    )
    o_ref[...] = (y + b2_ref[...]).astype(o_ref.dtype)


def my_ae_32(x, w_enc, b_enc, w_dec, b_dec, *, tb=2048):
    """Fused autoencoder forward.

    x: (B, 768) float32.
    w_enc: (32, 768), b_enc: (32,), w_dec: (768, 32), b_dec: (768,)  (torch Linear layout).
    Returns (B, 768) — same semantics as MyAE_32.forward.
    """
    B, d = x.shape
    assert d == D_IN

    # Effective batch tile:
    #  - as large as possible (default 2048) to amortize ~0.35 us per-grid-step overhead,
    #  - but capped so the grid keeps >= ~8 steps when B allows (pipelining + both v7x TCs),
    #  - always a multiple of 8 (sublane granularity).
    tb_eff = min(tb, max(8, _round_up(_cdiv(B, 8), 8)))
    grid = (_cdiv(B, tb_eff),)   # ragged last block handled by Pallas (masked writes)

    # Parameter layouts (all lane-dense):
    w1 = w_enc                       # (32, 768)  native torch layout
    w2 = w_dec.T                     # (32, 768)  lane-dense for h @ W
    b1 = b_enc.reshape(1, D_HID)     # (1, 32)
    b2 = b_dec.reshape(1, D_IN)      # (1, 768)

    param_bytes = (2 * D_HID * D_IN + D_HID + D_IN) * 4
    cost = pl.CostEstimate(
        flops=4 * B * D_IN * D_HID,               # two matmuls: 2*B*768*32 each
        transcendentals=0,
        bytes_accessed=2 * B * D_IN * 4 + param_bytes,
    )

    return pl.pallas_call(
        _ae_kernel,
        out_shape=jax.ShapeDtypeStruct((B, D_IN), x.dtype),
        grid_spec=pltpu.PrefetchScalarGridSpec(
            num_scalar_prefetch=0,
            grid=grid,
            in_specs=[
                # x tile (double-buffered by default).
                pl.BlockSpec((tb_eff, D_IN), lambda i: (i, 0)),
                # Parameters: constant index_map -> single buffer is enough.
                pl.BlockSpec((D_HID, D_IN), lambda i: (0, 0),
                             pipeline_mode=pl.Buffered(1)),
                pl.BlockSpec((1, D_HID), lambda i: (0, 0),
                             pipeline_mode=pl.Buffered(1)),
                pl.BlockSpec((D_HID, D_IN), lambda i: (0, 0),
                             pipeline_mode=pl.Buffered(1)),
                pl.BlockSpec((1, D_IN), lambda i: (0, 0),
                             pipeline_mode=pl.Buffered(1)),
            ],
            out_specs=pl.BlockSpec((tb_eff, D_IN), lambda i: (i, 0)),
        ),
        compiler_params=pltpu.CompilerParams(
            dimension_semantics=("parallel",),
            # tb=2048 needs ~24.5 MiB; 32 MiB is <= physical VMEM on v5e/v6e/v7x.
            vmem_limit_bytes=32 * 1024 * 1024,
        ),
        cost_estimate=cost,
    )(x, w1, b1, w2, b2)


def _reference(x, w_enc, b_enc, w_dec, b_dec):
    h = jnp.maximum(
        jnp.matmul(x, w_enc.T, precision=lax.Precision.HIGHEST) + b_enc, 0.0)
    return jnp.matmul(h, w_dec.T, precision=lax.Precision.HIGHEST) + b_dec


if __name__ == "__main__":
    key = jax.random.PRNGKey(0)
    k_x, k_w1, k_b1, k_w2, k_b2 = jax.random.split(key, 5)

    # Deterministic synthetic parameters (torch nn.Linear shapes: weight (out, in), bias (out,))
    w_enc = jax.random.normal(k_w1, (D_HID, D_IN), dtype=jnp.float32) * 0.02
    b_enc = jax.random.normal(k_b1, (D_HID,), dtype=jnp.float32) * 0.02
    w_dec = jax.random.normal(k_w2, (D_IN, D_HID), dtype=jnp.float32) * 0.02
    b_dec = jax.random.normal(k_b2, (D_IN,), dtype=jnp.float32) * 0.02

    # Small tile-aligned batch (single grid step).
    B = 8
    x = jax.random.normal(k_x, (B, D_IN), dtype=jnp.float32)
    out = jax.block_until_ready(my_ae_32(x, w_enc, b_enc, w_dec, b_dec))
    y_ref = _reference(x, w_enc, b_enc, w_dec, b_dec)
    assert out.shape == (B, D_IN)
    assert jnp.allclose(out, y_ref, atol=1e-4, rtol=1e-4)

    # Non-tile-multiple batch: exercises the multi-step grid with a masked ragged
    # last block (no wrapper-side padding or slicing).
    B2 = 20
    x2 = jax.random.normal(jax.random.PRNGKey(1), (B2, D_IN), dtype=jnp.float32)
    out2 = jax.block_until_ready(my_ae_32(x2, w_enc, b_enc, w_dec, b_dec))
    y_ref2 = _reference(x2, w_enc, b_enc, w_dec, b_dec)
    assert out2.shape == (B2, D_IN)
    assert jnp.allclose(out2, y_ref2, atol=1e-4, rtol=1e-4)

    print("KERNEL_OK")
</pallas_src>

<mosaic_0001>
module attributes {stable_mosaic.version = 11 : i64} {
  func.func @_ae_kernel(%arg0: i32, %arg1: memref<8x768xf32, #tpu.memory_space<vmem>>, %arg2: memref<32x768xf32, #tpu.memory_space<vmem>>, %arg3: memref<1x32xf32, #tpu.memory_space<vmem>>, %arg4: memref<32x768xf32, #tpu.memory_space<vmem>>, %arg5: memref<1x768xf32, #tpu.memory_space<vmem>>, %arg6: memref<8x768xf32, #tpu.memory_space<vmem>>) attributes {dimension_semantics = [#tpu.dimension_semantics<parallel>], iteration_bounds = array<i64: 1>, scalar_prefetch = 0 : i64, scratch_operands = 0 : i64, tpu.core_type = #tpu.core_type<tc>, window_params = [{transform_indices = @transform_0, window_bounds = array<i64: 8, 768>}, {pipeline_mode = #tpu.pipeline_mode<synchronous>, transform_indices = @transform_1, window_bounds = array<i64: 32, 768>}, {pipeline_mode = #tpu.pipeline_mode<synchronous>, transform_indices = @transform_2, window_bounds = array<i64: 1, 32>}, {pipeline_mode = #tpu.pipeline_mode<synchronous>, transform_indices = @transform_3, window_bounds = array<i64: 32, 768>}, {pipeline_mode = #tpu.pipeline_mode<synchronous>, transform_indices = @transform_4, window_bounds = array<i64: 1, 768>}, {transform_indices = @transform_5, window_bounds = array<i64: 8, 768>}]} {
    %c0 = arith.constant 0 : index
    %c0_0 = arith.constant 0 : index
    %0 = vector.load %arg1[%c0, %c0_0] : memref<8x768xf32, #tpu.memory_space<vmem>>, vector<8x768xf32>
    %c0_1 = arith.constant 0 : index
    %c0_2 = arith.constant 0 : index
    %1 = vector.load %arg2[%c0_1, %c0_2] : memref<32x768xf32, #tpu.memory_space<vmem>>, vector<32x768xf32>
    %cst = arith.constant dense<0.000000e+00> : vector<8x32xf32>
    %2 = tpu.matmul %0, %1, %cst {dimension_numbers = #tpu.dot_dimension_numbers<[1], [1], [0], [0], [0, 0, 1, 0], [], []>, precision = #tpu.contract_precision<fp32>} : vector<8x768xf32>, vector<32x768xf32>, vector<8x32xf32> -> vector<8x32xf32>
    %c0_3 = arith.constant 0 : index
    %c0_4 = arith.constant 0 : index
    %3 = vector.load %arg3[%c0_3, %c0_4] : memref<1x32xf32, #tpu.memory_space<vmem>>, vector<1x32xf32>
    %4 = vector.broadcast %3 : vector<1x32xf32> to vector<8x32xf32>
    %5 = arith.addf %2, %4 : vector<8x32xf32>
    %cst_5 = arith.constant 0.000000e+00 : f32
    %6 = vector.broadcast %cst_5 : f32 to vector<8x32xf32>
    %7 = arith.maximumf %5, %6 : vector<8x32xf32>
    %c0_6 = arith.constant 0 : index
    %c0_7 = arith.constant 0 : index
    %8 = vector.load %arg4[%c0_6, %c0_7] : memref<32x768xf32, #tpu.memory_space<vmem>>, vector<32x768xf32>
    %cst_8 = arith.constant dense<0.000000e+00> : vector<8x768xf32>
    %9 = tpu.matmul %7, %8, %cst_8 {dimension_numbers = #tpu.dot_dimension_numbers<[1], [0], [0], [1], [0, 0, 1, 1], [], []>, precision = #tpu.contract_precision<fp32>} : vector<8x32xf32>, vector<32x768xf32>, vector<8x768xf32> -> vector<8x768xf32>
    %c0_9 = arith.constant 0 : index
    %c0_10 = arith.constant 0 : index
    %10 = vector.load %arg5[%c0_9, %c0_10] : memref<1x768xf32, #tpu.memory_space<vmem>>, vector<1x768xf32>
    %11 = vector.broadcast %10 : vector<1x768xf32> to vector<8x768xf32>
    %12 = arith.addf %9, %11 : vector<8x768xf32>
    %c0_11 = arith.constant 0 : index
    %c0_12 = arith.constant 0 : index
    %13 = vector.load %arg6[%c0_11, %c0_12] : memref<8x768xf32, #tpu.memory_space<vmem>>, vector<8x768xf32>
    tpu.vector_store %arg6[%c0_11, %c0_12], %12 {strides = array<i32>} : memref<8x768xf32, #tpu.memory_space<vmem>>, vector<8x768xf32>,
    return
  }
  func.func @transform_0(%arg0: i32) -> (i32, i32) {
    %c0_i32 = arith.constant 0 : i32
    %c0_i32_0 = arith.constant 0 : i32
    return %arg0, %c0_i32 : i32, i32
  }
  func.func @transform_1(%arg0: i32) -> (i32, i32) {
    %c0_i32 = arith.constant 0 : i32
    %c0_i32_0 = arith.constant 0 : i32
    %c0_i32_1 = arith.constant 0 : i32
    return %c0_i32, %c0_i32_0 : i32, i32
  }
  func.func @transform_2(%arg0: i32) -> (i32, i32) {
    %c0_i32 = arith.constant 0 : i32
    %c0_i32_0 = arith.constant 0 : i32
    %c0_i32_1 = arith.constant 0 : i32
    return %c0_i32, %c0_i32_0 : i32, i32
  }
  func.func @transform_3(%arg0: i32) -> (i32, i32) {
    %c0_i32 = arith.constant 0 : i32
    %c0_i32_0 = arith.constant 0 : i32
    %c0_i32_1 = arith.constant 0 : i32
    return %c0_i32, %c0_i32_0 : i32, i32
  }
  func.func @transform_4(%arg0: i32) -> (i32, i32) {
    %c0_i32 = arith.constant 0 : i32
    %c0_i32_0 = arith.constant 0 : i32
    %c0_i32_1 = arith.constant 0 : i32
    return %c0_i32, %c0_i32_0 : i32, i32
  }
  func.func @transform_5(%arg0: i32) -> (i32, i32) {
    %c0_i32 = arith.constant 0 : i32
    %c0_i32_0 = arith.constant 0 : i32
    return %arg0, %c0_i32 : i32, i32
  }
}

</mosaic_0001>

<bundles_post_ra>
// kernel: tpu_custom_call.1
= control target key start
LH: loop header
LB: loop body
LE: loop exit
PB: predicated region body
PF: predicated region fallthrough
CT: control target
= control target key end

     0   :  { %10 = vsyncpa [#allocation3], 0  ;;  %s4537_s0 = inlined_call_operand.hbm [shape: f32[8,768], index: 0, kind: input, shape index: {}]   ;;  %s4538_s1 = inlined_call_operand.hbm [shape: f32[32,768], index: 1, kind: input, shape index: {}]   ;;  %s4539_s2 = inlined_call_operand.vmem [shape: f32[1,32], index: 2, kind: input, shape index: {}]   ;;  %s4540_s3 = inlined_call_operand.hbm [shape: f32[32,768], index: 3, kind: input, shape index: {}]   ;;  %s4541_s4 = inlined_call_operand.vmem [shape: f32[1,768], index: 4, kind: input, shape index: {}]   ;;  %s4542_s5 = inlined_call_operand.hbm [shape: f32[8,768], index: 5, kind: output, shape index: {}]  }
   0x1   :  { %11 = vsyncpa [#allocation6], 0 }
   0x2   :  { %12 = vsyncpa [#allocation4], 0  ;;  %s3919_s18 = smov [#allocation5]   ;;  %s3825_s22 = scalar_lea.hbm %s4538_s1, 3072 }
   0x3   :  { %s28_s19 = sshll.u32 %s3919_s18, 4  ;;  %p3826_p0 = scmp.ne.s32.totalorder %s4538_s1, %s3825_s22  ;;  %s29_s19 = int_to_ptr.vmem [resolvable:$true] %s28_s19 }
   0x4   :  { %p3829_p1 = scmp.lt.u32.totalorder %s3825_s22, %s4538_s1 }
   0x6   :  { %p3831_p2 = pnand %p3829_p1, %p3826_p0 }
   0x8   :  { %3834 = shalt.err (!%p3831_p2)
}
   0x9   :  { %s3835_s27 = scalar_lea.vmem %s29_s19, 3072  ;;  %p3840_p4 = scmp.lt.s32.totalorder %s29_s19, %s29_s19 }
   0xa   :  { %p3836_p3 = scmp.ne.s32.totalorder %s29_s19, %s3835_s27  ;;  %p3841_p5 = scmp.lt.s32.totalorder %s3835_s27, %s3835_s27 }
   0xc   :  { %p3842_p6 = por %p3841_p5, %p3840_p4 }
   0xe   :  { %p3843_p7 = pnand %p3842_p6, %p3836_p3 }
  0x10   :  { %3846 = shalt.err (!%p3843_p7)
}
  0x11   :  { %s3920_s28 = smov 768   ;;  %s3921_s29 = smov 48  }
  0x12   :  { %34 = dma.hbm_to_vmem [thread:$0]  %s4538_s1, 3072, %s29_s19, [#allocation6], %s3920_s28, %s3920_s28, %s3921_s29  }
  0x13   :  { %s3922_s7 = smov [#allocation2]   ;;  %s3923_s9 = smov [#allocation7]  }
  0x14   :  { %s19_s8 = sshll.u32 %s3922_s7, 4  ;;  %s42_s10 = sshll.u32 %s3923_s9, 4  ;;  %s20_s8 = int_to_ptr.vmem [resolvable:$true] %s19_s8  ;;  %s43_s10 = int_to_ptr.vmem [resolvable:$true] %s42_s10 }
  0x15   :  { %s3847_s13 = scalar_lea.hbm %s4537_s0, 768 }
  0x16   :  { %p3848_p8 = scmp.ne.s32.totalorder %s4537_s0, %s3847_s13  ;;  %p3851_p9 = scmp.lt.u32.totalorder %s3847_s13, %s4537_s0 }
  0x18   :  { %p3853_p10 = pnand %p3851_p9, %p3848_p8 }
  0x1a   :  { %3856 = shalt.err (!%p3853_p10)
}
  0x1b   :  { %s3857_s1 = scalar_lea.vmem %s20_s8, 768  ;;  %p3862_p12 = scmp.lt.s32.totalorder %s20_s8, %s20_s8 }
  0x1c   :  { %p3858_p11 = scmp.ne.s32.totalorder %s20_s8, %s3857_s1  ;;  %p3863_p13 = scmp.lt.s32.totalorder %s3857_s1, %s3857_s1 }
  0x1e   :  { %p3864_p0 = por %p3863_p13, %p3862_p12 }
  0x20   :  { %p3865_p1 = pnand %p3864_p0, %p3858_p11 }
  0x22   :  { %3868 = shalt.err (!%p3865_p1)
}
  0x23   :  { %22 = dma.hbm_to_vmem [thread:$0]  %s4537_s0, 768, %s20_s8, [#allocation3]  }
  0x24   :  { %s3869_s22 = scalar_lea.hbm %s4540_s3, 3072 }
  0x25   :  { %p3870_p2 = scmp.ne.s32.totalorder %s4540_s3, %s3869_s22  ;;  %p3873_p3 = scmp.lt.u32.totalorder %s3869_s22, %s4540_s3 }
  0x27   :  { %p3875_p4 = pnand %p3873_p3, %p3870_p2 }
  0x29   :  { %3878 = shalt.err (!%p3875_p4)
}
  0x2a   :  { %s3879_s27 = scalar_lea.vmem %s43_s10, 3072  ;;  %p3884_p6 = scmp.lt.s32.totalorder %s43_s10, %s43_s10 }
  0x2b   :  { %p3880_p5 = scmp.ne.s32.totalorder %s43_s10, %s3879_s27  ;;  %p3885_p7 = scmp.lt.s32.totalorder %s3879_s27, %s3879_s27 }
  0x2d   :  { %p3886_p8 = por %p3885_p7, %p3884_p6 }
  0x2f   :  { %p3887_p9 = pnand %p3886_p8, %p3880_p5 }
  0x31   :  { %3890 = shalt.err (!%p3887_p9)
}
  0x32   :  { %48 = dma.hbm_to_vmem [thread:$0]  %s4540_s3, 3072, %s43_s10, [#allocation6], %s3920_s28, %s3920_s28, %s3921_s29  }
  0x33   :  { %3913 = dma.done.wait [#allocation3], 768  }
  0x34   :  { %3914 = vsyncadd [#allocation3], 4294966528 }
  0x35   :  { %3915 = dma.done.wait [#allocation6], 6144  }
  0x36   :  { %3916 = vsyncadd [#allocation6], 4294961152  ;;  %v67_v0 = vld [vmem:[#allocation5 + $0x8] sm:$0xff]  ;;  %v73_v1 = vld [vmem:[#allocation5 + $0x38] sm:$0xff]  ;;  %vm1804_vm0 = vcmask 261120  }
  0x37   :  { %v66_v2 = vld [vmem:[#allocation5] sm:$0xff]  ;;  %v97_v3 = vand.u32 4294901760, %v67_v0  ;;  %v101_v4 = vand.u32 4294901760, %v73_v1  ;;  %v72_v5 = vld [vmem:[#allocation5 + $0x30] sm:$0xff]  ;;  %v79_v7 = vld [vmem:[#allocation5 + $0x68] sm:$0xff] }
  0x38   :  { %v99_v6 = vand.u32 4294901760, %v66_v2  ;;  %v85_v8 = vld [vmem:[#allocation5 + $0x98] sm:$0xff]  ;;  %v103_v9 = vand.u32 4294901760, %v72_v5  ;;  %v105_v10 = vand.u32 4294901760, %v79_v7  ;;  %v78_v12 = vld [vmem:[#allocation5 + $0x60] sm:$0xff]  ;;  %v84_v13 = vld [vmem:[#allocation5 + $0x90] sm:$0xff] }
  0x39   :  { %v109_v11 = vand.u32 4294901760, %v85_v8  ;;  %v3998_v14 = vsub.f32 %v67_v0, %v97_v3  ;;  %v4000_v15 = vsub.f32 %v73_v1, %v101_v4  ;;  %v107_v17 = vand.u32 4294901760, %v78_v12  ;;  %v61_v31 = vld [vmem:[#allocation2 + $0x8] sm:$0xff]  ;;  %v60_v41 = vld [vmem:[#allocation2] sm:$0xff]  ;;  %v63_v43 = vld [vmem:[#allocation2 + $0x18] sm:$0xff] }
  0x3a   :  { %v4002_v16 = vsub.f32 %v66_v2, %v99_v6  ;;  %v4004_v18 = vsub.f32 %v72_v5, %v103_v9  ;;  %v4006_v19 = vsub.f32 %v79_v7, %v105_v10  ;;  %v111_v21 = vand.u32 4294901760, %v84_v13  ;;  %v69_v48 = vld [vmem:[#allocation5 + $0x18] sm:$0xff]  ;;  %v75_v49 = vld [vmem:[#allocation5 + $0x48] sm:$0xff]  ;;  %v68_v58 = vld [vmem:[#allocation5 + $0x10] sm:$0xff] }
  0x3b   :  { %v4008_v20 = vsub.f32 %v85_v8, %v109_v11  ;;  %v187_v22 = vand.u32 4294901760, %v3998_v14  ;;  %v199_v23 = vand.u32 4294901760, %v4000_v15  ;;  %v4013_v25 = vsub.f32 %v78_v12, %v107_v17  ;;  %v74_v59 = vld [vmem:[#allocation5 + $0x40] sm:$0xff]  ;;  %v81_v2 = vld [vmem:[#allocation5 + $0x78] sm:$0xff] }
  0x3c   :  { %v193_v24 = vand.u32 4294901760, %v4002_v16  ;;  %v205_v26 = vand.u32 4294901760, %v4004_v18  ;;  %v211_v27 = vand.u32 4294901760, %v4006_v19  ;;  %v4018_v29 = vsub.f32 %v84_v13, %v111_v21 }
  0x3d   :  { %v223_v28 = vand.u32 4294901760, %v4008_v20  ;;  %v3492_v30 = vpack.c.bf16 %v199_v23, %v187_v22  ;;  %v217_v34 = vand.u32 4294901760, %v4013_v25  ;;  %v4026_v36 = vand.u32 4294901760, %v61_v31 }
  0x3e   :  { %v3494_v32 = vpack.c.bf16 %v205_v26, %v193_v24  ;;  %v229_v35 = vand.u32 4294901760, %v4018_v29  ;;  %v4028_v37 = vpack.c.bf16 %v101_v4, %v97_v3  ;;  %v4030_v38 = vpack.c.bf16 %v103_v9, %v99_v6  ;;  %v87_v3 = vld [vmem:[#allocation5 + $0xa8] sm:$0xff] }
  0x3f   :  { %v3496_v33 = vpack.c.bf16 %v223_v28, %v211_v27  ;;  %3493 = vmatprep.subr.bf16.mxu0 %v3492_v30  ;;  %560 = vmatprep.mubr.f32.mxu0 %v4026_v36  ;;  %v4033_v39 = vpack.c.bf16 %v109_v11, %v105_v10  ;;  %v4039_v42 = vpack.c.bf16 %v111_v21, %v107_v17  ;;  %v4043_v46 = vand.u32 4294901760, %v60_v41 }
  0x40   :  { %3495 = vmatpush1.bf16.xpose.msra.mxu0 %v3494_v32  ;;  %3461 = vmatprep.subr.bf16.mxu1 %v4028_v37  ;;  %v3498_v40 = vpack.c.bf16 %v229_v35, %v217_v34  ;;  %v188_v44 = vsub.f32 %v3998_v14, %v187_v22  ;;  %v200_v45 = vsub.f32 %v4000_v15, %v199_v23  ;;  %v4046_v47 = vand.u32 4294901760, %v63_v43 }
  0x41   :  { %3497 = vmatprep.subr.bf16.mxu0 %v3496_v33  ;;  %3463 = vmatpush1.bf16.xpose.msra.mxu1 %v4030_v38  ;;  %v194_v52 = vsub.f32 %v4002_v16, %v193_v24  ;;  %v206_v53 = vsub.f32 %v4004_v18, %v205_v26  ;;  %v647_v55 = vand.u32 4294901760, %v69_v48  ;;  %v651_v56 = vand.u32 4294901760, %v75_v49  ;;  %v62_v26 = vld [vmem:[#allocation2 + $0x10] sm:$0xff] }
  0x42   :  { %3465 = vmatprep.subr.bf16.mxu1 %v4033_v39  ;;  %v189_v50 = vand.u32 4294901760, %v188_v44  ;;  %v201_v51 = vand.u32 4294901760, %v200_v45  ;;  %v4054_v54 = vsub.f32 %v63_v43, %v4046_v47  ;;  %v4058_v60 = vsub.f32 %v61_v31, %v4026_v36 }
  0x43   :  { %v195_v57 = vand.u32 4294901760, %v194_v52  ;;  %v4061_v62 = vsub.f32 %v60_v41, %v4043_v46  ;;  %v207_v63 = vand.u32 4294901760, %v206_v53  ;;  %v4064_v0 = vsub.f32 %v4013_v25, %v217_v34 }
  0x44   :  { %v3468_v61 = vpack.c.bf16 %v201_v51, %v189_v50  ;;  %v4066_v1 = vsub.f32 %v69_v48, %v647_v55  ;;  %v721_v4 = vand.u32 4294901760, %v4054_v54  ;;  %v4069_v5 = vpack.c.bf16 %v651_v56, %v647_v55  ;;  %v80_v48 = vld [vmem:[#allocation5 + $0x70] sm:$0xff] }
  0x45   :  { %v4071_v6 = vsub.f32 %v75_v49, %v651_v56  ;;  %v171_v7 = vand.u32 4294901760, %v4058_v60  ;;  %v177_v8 = vand.u32 4294901760, %v4061_v62  ;;  %v230_v9 = vsub.f32 %v4018_v29, %v229_v35  ;;  %v86_v56 = vld [vmem:[#allocation5 + $0xa0] sm:$0xff] }
  0x46   :  { %v649_v10 = vand.u32 4294901760, %v68_v58  ;;  %v653_v11 = vand.u32 4294901760, %v74_v59  ;;  %v212_v12 = vsub.f32 %v4006_v19, %v211_v27  ;;  %v655_v13 = vand.u32 4294901760, %v81_v2 }
  0x47   :  { %v659_v17 = vand.u32 4294901760, %v87_v3  ;;  %v172_v21 = vsub.f32 %v4058_v60, %v171_v7  ;;  %v178_v22 = vsub.f32 %v4061_v62, %v177_v8  ;;  %v722_v23 = vsub.f32 %v4054_v54, %v721_v4 }
  0x48   :  { %3499 = vmatpush1.bf16.xpose.msra.mxu0 %v3498_v40  ;;  %v737_v24 = vand.u32 4294901760, %v4066_v1  ;;  %v213_v27 = vand.u32 4294901760, %v212_v12  ;;  %v224_v30 = vsub.f32 %v4008_v20, %v223_v28  ;;  %v749_v31 = vand.u32 4294901760, %v4071_v6 }
  0x49   :  { %3501 = vmatprep.subr.bf16.mxu0 %v4028_v37  ;;  %3467 = vmatpush1.bf16.xpose.msra.mxu1 %v4039_v42  ;;  %v173_v32 = vand.u32 4294901760, %v172_v21  ;;  %v179_v33 = vand.u32 4294901760, %v178_v22  ;;  %v3470_v34 = vpack.c.bf16 %v207_v63, %v195_v57  ;;  %v219_v35 = vand.u32 4294901760, %v4064_v0 }
  0x4a   :  { %3469 = vmatprep.subr.bf16.mxu1 %v3468_v61  ;;  %v225_v40 = vand.u32 4294901760, %v224_v30  ;;  %v4096_v41 = vpack.c.bf16 %v653_v11, %v649_v10  ;;  %v4098_v43 = vsub.f32 %v68_v58, %v649_v10  ;;  %v4100_v44 = vsub.f32 %v74_v59, %v653_v11 }
  0x4b   :  { %v4102_v45 = vand.u32 4294901760, %v62_v26  ;;  %174 = vmatprep.mubr.f32.mxu1 %v173_v32  ;;  %v4104_v28 = vpack.c.bf16 %v659_v17, %v655_v13  ;;  %v723_v49 = vand.u32 4294901760, %v722_v23  ;;  %v738_v50 = vsub.f32 %v4066_v1, %v737_v24 }
  0x4c   :  { %v3472_v51 = vpack.c.bf16 %v225_v40, %v213_v27  ;;  %v231_v52 = vand.u32 4294901760, %v230_v9  ;;  %v4109_v53 = vsub.f32 %v81_v2, %v655_v13  ;;  %v4111_v55 = vsub.f32 %v87_v3, %v659_v17 }
  0x4d   :  { %v750_v57 = vsub.f32 %v4071_v6, %v749_v31  ;;  %v657_v58 = vand.u32 4294901760, %v80_v48  ;;  %v4119_v59 = vsub.f32 %v62_v26, %v4102_v45  ;;  %v661_v61 = vand.u32 4294901760, %v86_v56 }
  0x4e   :  { %v739_v63 = vand.u32 4294901760, %v738_v50  ;;  %v743_v0 = vand.u32 4294901760, %v4098_v43  ;;  %v755_v2 = vand.u32 4294901760, %v4100_v44  ;;  %v773_v9 = vand.u32 4294901760, %v4111_v55 }
  0x4f   :  { %562 = vmatmul.mubr.f32.vlgmr.msra.gmra.mrb[0].mxu0 %v4043_v46  ;;  %v751_v3 = vand.u32 4294901760, %v750_v57  ;;  %v3474_v10 = vpack.c.bf16 %v231_v52, %v219_v35  ;;  %v3476_v11 = vpack.c.bf16 %v4000_v15, %v3998_v14  ;;  %v4129_v12 = vsub.f32 %v80_v48, %v657_v58 }
  0x50   :  { %3503 = vmatpush1.bf16.xpose.msra.mxu0 %v4030_v38  ;;  %640 = vmatprep.mubr.f32.mxu0 %v4026_v36  ;;  %v727_v13 = vand.u32 4294901760, %v4119_v59  ;;  %v4132_v17 = vpack.c.bf16 %v661_v61, %v657_v58  ;;  %v4134_v21 = vsub.f32 %v86_v56, %v661_v61  ;;  %v744_v22 = vsub.f32 %v4098_v43, %v743_v0 }
  0x51   :  { %3505 = vmatprep.subr.bf16.mxu0 %v4033_v39  ;;  %180 = vmatmul.mubr.f32.vlgmr.msra.gmra.mrb[0].mxu1 %v179_v33  ;;  %v756_v23 = vsub.f32 %v4100_v44, %v755_v2  ;;  %v3516_v26 = vpack.c.bf16 %v751_v3, %v739_v63  ;;  %v774_v15 = vsub.f32 %v4111_v55, %v773_v9  ;;  %v767_v33 = vand.u32 4294901760, %v4129_v12  ;;  %v64_v63 = vld [vmem:[#allocation2 + $0x20] sm:$0xff] }
  0x52   :  { %3471 = vmatpush1.bf16.xpose.msra.mxu1 %v3470_v34  ;;  %290 = vmatprep.mubr.f32.mxu1 %v4026_v36  ;;  %v761_v36 = vand.u32 4294901760, %v4109_v53  ;;  %v728_v27 = vsub.f32 %v4119_v59, %v727_v13  ;;  %v745_v30 = vand.u32 4294901760, %v744_v22  ;;  %v779_v34 = vand.u32 4294901760, %v4134_v21 }
  0x53   :  { %3473 = vmatprep.subr.bf16.mxu1 %v3472_v51  ;;  %v757_v32 = vand.u32 4294901760, %v756_v23  ;;  %v775_v40 = vand.u32 4294901760, %v774_v15  ;;  %v3478_v48 = vpack.c.bf16 %v4004_v18, %v4002_v16  ;;  %v768_v52 = vsub.f32 %v4129_v12, %v767_v33 }
  0x54   :  { %v762_v14 = vsub.f32 %v4109_v53, %v761_v36  ;;  %v729_v50 = vand.u32 4294901760, %v728_v27  ;;  %v780_v56 = vsub.f32 %v4134_v21, %v779_v34  ;;  %v3482_v18 = vpack.c.bf16 %v4018_v29, %v4013_v25 }
  0x55   :  { %v3518_v51 = vpack.c.bf16 %v757_v32, %v745_v30  ;;  %v769_v58 = vand.u32 4294901760, %v768_v52  ;;  %v3528_v61 = vpack.c.bf16 %v4111_v55, %v4109_v53  ;;  %v3530_v25 = vpack.c.bf16 %v4134_v21, %v4129_v12  ;;  %v82_v12 = vld [vmem:[#allocation5 + $0x80] sm:$0xff] }
  0x56   :  { %v763_v35 = vand.u32 4294901760, %v762_v14  ;;  %v781_v16 = vand.u32 4294901760, %v780_v56  ;;  %v3540_v29 = vpack.c.bf16 %v749_v31, %v737_v24  ;;  %v1207_v14 = vand.u32 4294901760, %v82_v12 }
  0x58   :  { %3507 = vmatpush1.bf16.xpose.msra.mxu0 %v4039_v42  ;;  %v3520_v57 = vpack.c.bf16 %v775_v40, %v763_v35 }
  0x59   :  { %3509 = vmatprep.subr.bf16.mxu0 %v4069_v5 }
  0x5a   :  { %3475 = vmatpush1.bf16.xpose.msra.mxu1 %v3474_v10 }
  0x5b   :  { %3477 = vmatprep.subr.bf16.mxu1 %v3476_v11 }
  0x5f   :  { %642 = vmatmul.mubr.f32.vlgmr.msra.gmra.mrb[0].mxu0 %v4043_v46 }
  0x60   :  { %3511 = vmatpush1.bf16.xpose.msra.mxu0 %v4096_v41  ;;  %724 = vmatprep.mubr.f32.mxu0 %v723_v49  ;;  %v3480_v49 = vpack.c.bf16 %v4008_v20, %v4006_v19  ;;  %v3522_v19 = vpack.c.bf16 %v781_v16, %v769_v58  ;;  %v3524_v20 = vpack.c.bf16 %v4071_v6, %v4066_v1 }
  0x61   :  { %3513 = vmatprep.subr.bf16.mxu0 %v4104_v28  ;;  %292 = vmatmul.mubr.f32.vlgmr.msra.gmra.mrb[0].mxu1 %v4043_v46  ;;  %v3526_v46 = vpack.c.bf16 %v4100_v44, %v4098_v43  ;;  %v89_v44 = vld [vmem:[#allocation5 + $0xb8] sm:$0xff] }
  0x62   :  { %3479 = vmatpush1.bf16.xpose.msra.mxu1 %v3478_v48  ;;  %379 = vmatprep.mubr.f32.mxu1 %v4058_v60  ;;  %v71_v60 = vld [vmem:[#allocation5 + $0x28] sm:$0xff] }
  0x63   :  { %3481 = vmatprep.subr.bf16.mxu1 %v3480_v49  ;;  %v1316_v49 = vsub.f32 %v82_v12, %v1207_v14  ;;  %v1761_v12 = vld [vmem:[#allocation7 + $0x68] sm:$0xff] }
  0x68   :  { %3515 = vmatpush1.bf16.xpose.msra.mxu0 %v4132_v17 }
  0x69   :  { %3517 = vmatprep.subr.bf16.mxu0 %v3516_v26 }
  0x6a   :  { %3483 = vmatpush1.bf16.xpose.msra.mxu1 %v3482_v18 }
  0x6b   :  { %3485 = vmatprep.subr.bf16.mxu1 %v4028_v37  ;;  %v3542_v37 = vpack.c.bf16 %v755_v2, %v743_v0 }
  0x6f   :  { %730 = vmatmul.mubr.f32.vlgmr.msra.gmra.mrb[0].mxu0 %v729_v50 }
  0x70   :  { %3519 = vmatpush1.bf16.xpose.msra.mxu0 %v3518_v51  ;;  %840 = vmatprep.mubr.f32.mxu0 %v4046_v47 }
  0x71   :  { %3521 = vmatprep.subr.bf16.mxu0 %v3520_v57  ;;  %382 = vmatmul.mubr.f32.vlgmr.msra.gmra.mrb[0].mxu1 %v4061_v62  ;;  %v77_v62 = vld [vmem:[#allocation5 + $0x58] sm:$0xff] }
  0x72   :  { %3487 = vmatpush1.bf16.xpose.msra.mxu1 %v4030_v38  ;;  %462 = vmatprep.mubr.f32.mxu1 %v171_v7  ;;  %v3544_v38 = vpack.c.bf16 %v773_v9, %v761_v36  ;;  %v1201_v6 = vand.u32 4294901760, %v77_v62  ;;  %v70_v7 = vld [vmem:[#allocation5 + $0x20] sm:$0xff]  ;;  %v4232_v36 = vand.u32 4294901760, %v64_v63 }
  0x73   :  { %3489 = vmatprep.subr.bf16.mxu1 %v4033_v39  ;;  %v3546_v39 = vpack.c.bf16 %v779_v34, %v767_v33 }
  0x74   :  { %v4221_v43 = vsub.f32 %v77_v62, %v1201_v6  ;;  %v1276_v27 = vsub.f32 %v64_v63, %v4232_v36  ;;  %v1748_v63 = vld [vmem:[#allocation7] sm:$0xff] }
  0x76   :  { %v1299_v2 = vand.u32 4294901760, %v4221_v43  ;;  %v1277_v48 = vand.u32 4294901760, %v1276_v27 }
  0x78   :  { %3523 = vmatpush1.bf16.xpose.msra.mxu0 %v3522_v19  ;;  %v1300_v26 = vsub.f32 %v4221_v43, %v1299_v2  ;;  %v1278_v16 = vsub.f32 %v1276_v27, %v1277_v48 }
  0x79   :  { %3525 = vmatprep.subr.bf16.mxu0 %v3524_v20  ;;  %v1317_v20 = vand.u32 4294901760, %v1316_v49 }
  0x7a   :  { %3491 = vmatpush1.bf16.xpose.msra.mxu1 %v4039_v42  ;;  %v65_v42 = vld [vmem:[#allocation2 + $0x28] sm:$0xff]  ;;  %v1301_v34 = vand.u32 4294901760, %v1300_v26 }
  0x7f   :  { %842 = vmatmul.mubr.f32.vlgmr.msra.gmra.mrb[0].mxu0 %v4102_v45 }
  0x80   :  { %3527 = vmatpush1.bf16.xpose.msra.mxu0 %v3526_v46  ;;  %929 = vmatprep.mubr.f32.mxu0 %v4054_v54  ;;  %v4207_v54 = vand.u32 4294901760, %v65_v42 }
  0x81   :  { %3529 = vmatprep.subr.bf16.mxu0 %v3528_v61  ;;  %466 = vmatmul.mubr.f32.vlgmr.msra.gmra.mrb[0].mxu1 %v177_v8 }
  0x82   :  { %v4213_v1 = vsub.f32 %v65_v42, %v4207_v54 }
  0x84   :  { %v1271_v8 = vand.u32 4294901760, %v4213_v1 }
  0x88   :  { %3531 = vmatpush1.bf16.xpose.msra.mxu0 %v3530_v25 }
  0x89   :  { %3533 = vmatprep.subr.bf16.mxu0 %v4069_v5 }
  0x8f   :  { %932 = vmatmul.mubr.f32.vlgmr.msra.gmra.mrb[0].mxu0 %v4119_v59  ;;  %v1272_v59 = vsub.f32 %v4213_v1, %v1271_v8 }
  0x90   :  { %3535 = vmatpush1.bf16.xpose.msra.mxu0 %v4096_v41  ;;  %1012 = vmatprep.mubr.f32.mxu0 %v721_v4  ;;  %v1197_v4 = vand.u32 4294901760, %v71_v60 }
  0x91   :  { %3537 = vmatprep.subr.bf16.mxu0 %v4104_v28 }
  0x92   :  { %v4217_v24 = vpack.c.bf16 %v1201_v6, %v1197_v4  ;;  %v4219_v31 = vsub.f32 %v71_v60, %v1197_v4 }
  0x94   :  { %v1287_v0 = vand.u32 4294901760, %v4219_v31  ;;  %v3572_v6 = vpack.c.bf16 %v4221_v43, %v4219_v31  ;;  %v1755_v43 = vld [vmem:[#allocation7 + $0x38] sm:$0xff] }
  0x96   :  { %v1288_v23 = vsub.f32 %v4219_v31, %v1287_v0  ;;  %v1749_v31 = vld [vmem:[#allocation7 + $0x8] sm:$0xff] }
  0x98   :  { %3539 = vmatpush1.bf16.xpose.msra.mxu0 %v4132_v17  ;;  %v1289_v33 = vand.u32 4294901760, %v1288_v23  ;;  %v1766_v23 = vld [vmem:[#allocation7 + $0x90] sm:$0xff] }
  0x99   :  { %3541 = vmatprep.subr.bf16.mxu0 %v3540_v29  ;;  %v1279_v29 = vand.u32 4294901760, %v1278_v16 }
  0x9a   :  { %v3564_v56 = vpack.c.bf16 %v1301_v34, %v1289_v33 }
  0x9f   :  { %1016 = vmatmul.mubr.f32.vlgmr.msra.gmra.mrb[0].mxu0 %v727_v13  ;;  %v88_v13 = vld [vmem:[#allocation5 + $0xb0] sm:$0xff] }
  0xa0   :  { %3543 = vmatpush1.bf16.xpose.msra.mxu0 %v3542_v37  ;;  %1110 = vmatprep.mubr.f32.mxu0 %v4046_v47  ;;  %v1211_v15 = vand.u32 4294901760, %v88_v13 }
  0xa1   :  { %3545 = vmatprep.subr.bf16.mxu0 %v3544_v38  ;;  %v1318_v38 = vsub.f32 %v1316_v49, %v1317_v20 }
  0xa2   :  { %v1328_v50 = vsub.f32 %v88_v13, %v1211_v15  ;;  %v1767_v13 = vld [vmem:[#allocation7 + $0x98] sm:$0xff] }
  0xa3   :  { %v1319_v60 = vand.u32 4294901760, %v1318_v38 }
  0xa4   :  { %v1329_v46 = vand.u32 4294901760, %v1328_v50 }
  0xa8   :  { %3547 = vmatpush1.bf16.xpose.msra.mxu0 %v3546_v39  ;;  %v1330_v39 = vsub.f32 %v1328_v50, %v1329_v46 }
  0xa9   :  { %3549 = vmatprep.subr.bf16.mxu0 %v4069_v5  ;;  %v76_v5 = vld [vmem:[#allocation5 + $0x50] sm:$0xff] }
  0xaa   :  { %v1203_v53 = vand.u32 4294901760, %v76_v5  ;;  %v1331_v62 = vand.u32 4294901760, %v1330_v39 }
  0xac   :  { %v4236_v10 = vsub.f32 %v76_v5, %v1203_v53  ;;  %v3570_v4 = vpack.c.bf16 %v1331_v62, %v1319_v60 }
  0xae   :  { %v1305_v32 = vand.u32 4294901760, %v4236_v10 }
  0xaf   :  { %1112 = vmatmul.mubr.f32.vlgmr.msra.gmra.mrb[0].mxu0 %v4102_v45 }
  0xb0   :  { %3551 = vmatpush1.bf16.xpose.msra.mxu0 %v4096_v41  ;;  %1190 = vmatprep.mubr.f32.mxu0 %v4046_v47  ;;  %v83_v41 = vld [vmem:[#allocation5 + $0x88] sm:$0xff]  ;;  %v1199_v47 = vand.u32 4294901760, %v70_v7  ;;  %v1306_v52 = vsub.f32 %v4236_v10, %v1305_v32 }
  0xb1   :  { %3553 = vmatprep.subr.bf16.mxu0 %v4104_v28  ;;  %v1205_v55 = vand.u32 4294901760, %v83_v41  ;;  %v1209_v28 = vand.u32 4294901760, %v89_v44 }
  0xb2   :  { %v4230_v3 = vpack.c.bf16 %v1203_v53, %v1199_v47  ;;  %v4234_v9 = vsub.f32 %v70_v7, %v1199_v47  ;;  %v1307_v19 = vand.u32 4294901760, %v1306_v52 }
  0xb3   :  { %v4238_v11 = vpack.c.bf16 %v1209_v28, %v1205_v55  ;;  %v4240_v21 = vsub.f32 %v83_v41, %v1205_v55  ;;  %v4242_v22 = vsub.f32 %v89_v44, %v1209_v28  ;;  %v3578_v41 = vpack.c.bf16 %v1328_v50, %v1316_v49 }
  0xb4   :  { %v1293_v30 = vand.u32 4294901760, %v4234_v9  ;;  %v3574_v7 = vpack.c.bf16 %v4236_v10, %v4234_v9  ;;  %v3588_v44 = vpack.c.bf16 %v1299_v2, %v1287_v0  ;;  %v3594_v55 = vpack.c.bf16 %v1329_v46, %v1317_v20 }
  0xb5   :  { %v1311_v35 = vand.u32 4294901760, %v4240_v21  ;;  %v1323_v40 = vand.u32 4294901760, %v4242_v22  ;;  %v3576_v5 = vpack.c.bf16 %v4242_v22, %v4240_v21  ;;  %v1808_v28 = vand.u32 4294901760, %v1749_v31 }
  0xb6   :  { %v1294_v51 = vsub.f32 %v4234_v9, %v1293_v30  ;;  %v3590_v47 = vpack.c.bf16 %v1305_v32, %v1293_v30  ;;  %v1810_v0 = vand.u32 4294901760, %v1748_v63 }
  0xb7   :  { %v1312_v57 = vsub.f32 %v4240_v21, %v1311_v35  ;;  %v1324_v58 = vsub.f32 %v4242_v22, %v1323_v40  ;;  %v3592_v53 = vpack.c.bf16 %v1323_v40, %v1311_v35  ;;  %v1820_v21 = vand.u32 4294901760, %v1767_v13  ;;  %v1760_v22 = vld [vmem:[#allocation7 + $0x60] sm:$0xff] }
  0xb8   :  { %3555 = vmatpush1.bf16.xpose.msra.mxu0 %v4132_v17  ;;  %v1273_v17 = vand.u32 4294901760, %v1272_v59  ;;  %v1295_v18 = vand.u32 4294901760, %v1294_v51  ;;  %v1812_v59 = vand.u32 4294901760, %v1755_v43  ;;  %v3924_v35 = vmov 0.0  }
  0xb9   :  { %3557 = vmatprep.subr.bf16.mxu0 %v4217_v24  ;;  %v1313_v61 = vand.u32 4294901760, %v1312_v57  ;;  %v1325_v25 = vand.u32 4294901760, %v1324_v58  ;;  %v4310_v34 = vsub.f32 %v1767_v13, %v1820_v21  ;;  %1880 = vmatprep.mubr.f32.mxu1 %v3924_v35 }
  0xba   :  { %v3566_v37 = vpack.c.bf16 %v1307_v19, %v1295_v18  ;;  %v4289_v9 = vpack.c.bf16 %v1812_v59, %v1808_v28 }
  0xbb   :  { %v3568_v42 = vpack.c.bf16 %v1325_v25, %v1313_v61  ;;  %v1930_v16 = vand.u32 4294901760, %v4310_v34 }
  0xbc   :  { %3605 = vmatprep.subr.bf16.mxu1 %v4289_v9 }
  0xbf   :  { %1192 = vmatmul.mubr.f32.vlgmr.msra.gmra.mrb[0].mxu0 %v4102_v45  ;;  %v3562_v45 = vpack.c.bf16 %v1211_v15, %v1207_v14  ;;  %v1818_v15 = vand.u32 4294901760, %v1760_v22 }
  0xc0   :  { %3559 = vmatpush1.bf16.xpose.msra.mxu0 %v4230_v3  ;;  %1274 = vmatprep.mubr.f32.mxu0 %v1273_v17  ;;  %v1816_v17 = vand.u32 4294901760, %v1761_v12 }
  0xc1   :  { %3561 = vmatprep.subr.bf16.mxu0 %v4238_v11 }
  0xc2   :  { %v4306_v32 = vpack.c.bf16 %v1820_v21, %v1816_v17  ;;  %v4308_v33 = vsub.f32 %v1761_v12, %v1816_v17  ;;  %v1757_v17 = vld [vmem:[#allocation7 + $0x48] sm:$0xff] }
  0xc4   :  { %v1918_v58 = vand.u32 4294901760, %v4308_v33 }
  0xc6   :  { %v1919_v25 = vsub.f32 %v4308_v33, %v1918_v58 }
  0xc8   :  { %3563 = vmatpush1.bf16.xpose.msra.mxu0 %v3562_v45 }
  0xc9   :  { %3565 = vmatprep.subr.bf16.mxu0 %v3564_v56 }
  0xcf   :  { %1280 = vmatmul.mubr.f32.vlgmr.msra.gmra.mrb[0].mxu0 %v1279_v29  ;;  %v1931_v29 = vsub.f32 %v4310_v34, %v1930_v16 }
  0xd0   :  { %3567 = vmatpush1.bf16.xpose.msra.mxu0 %v3566_v37  ;;  %1390 = vmatprep.mubr.f32.mxu0 %v4207_v54 }
  0xd1   :  { %3569 = vmatprep.subr.bf16.mxu0 %v3568_v42  ;;  %v1920_v42 = vand.u32 4294901760, %v1919_v25  ;;  %v1932_v60 = vand.u32 4294901760, %v1931_v29 }
  0xd8   :  { %3571 = vmatpush1.bf16.xpose.msra.mxu0 %v3570_v4 }
  0xd9   :  { %3573 = vmatprep.subr.bf16.mxu0 %v3572_v6 }
  0xdf   :  { %1392 = vmatmul.mubr.f32.vlgmr.msra.gmra.mrb[0].mxu0 %v4232_v36 }
  0xe0   :  { %3575 = vmatpush1.bf16.xpose.msra.mxu0 %v3574_v7  ;;  %1479 = vmatprep.mubr.f32.mxu0 %v4213_v1  ;;  %v3616_v7 = vpack.c.bf16 %v1932_v60, %v1920_v42 }
  0xe1   :  { %3577 = vmatprep.subr.bf16.mxu0 %v3576_v5 }
  0xe8   :  { %3579 = vmatpush1.bf16.xpose.msra.mxu0 %v3578_v41 }
  0xe9   :  { %3581 = vmatprep.subr.bf16.mxu0 %v4217_v24 }
  0xef   :  { %1482 = vmatmul.mubr.f32.vlgmr.msra.gmra.mrb[0].mxu0 %v1276_v27  ;;  %v1822_v27 = vand.u32 4294901760, %v1766_v23 }
  0xf0   :  { %3583 = vmatpush1.bf16.xpose.msra.mxu0 %v4230_v3  ;;  %1562 = vmatprep.mubr.f32.mxu0 %v1271_v8 }
  0xf1   :  { %3585 = vmatprep.subr.bf16.mxu0 %v4238_v11  ;;  %v1935_v49 = vsub.f32 %v1766_v23, %v1822_v27  ;;  %v1750_v23 = vld [vmem:[#allocation7 + $0x10] sm:$0xff] }
  0xf3   :  { %v1936_v46 = vand.u32 4294901760, %v1935_v49 }
  0xf5   :  { %v1937_v39 = vsub.f32 %v1935_v49, %v1936_v46 }
  0xf7   :  { %v1938_v6 = vand.u32 4294901760, %v1937_v39 }
  0xf8   :  { %3587 = vmatpush1.bf16.xpose.msra.mxu0 %v3562_v45 }
  0xf9   :  { %3589 = vmatprep.subr.bf16.mxu0 %v3588_v44 }
  0xff   :  { %1566 = vmatmul.mubr.f32.vlgmr.msra.gmra.mrb[0].mxu0 %v1277_v48  ;;  %v1923_v48 = vsub.f32 %v1760_v22, %v1818_v15  ;;  %v2355_v22 = vand.u32 4294901760, %v1757_v17 }
 0x100   :  { %3591 = vmatpush1.bf16.xpose.msra.mxu0 %v3590_v47  ;;  %1660 = vmatprep.mubr.f32.mxu0 %v4207_v54  ;;  %v3624_v47 = vpack.c.bf16 %v4310_v34, %v4308_v33 }
 0x101   :  { %3593 = vmatprep.subr.bf16.mxu0 %v3592_v53  ;;  %v1924_v20 = vand.u32 4294901760, %v1923_v48  ;;  %v3626_v53 = vpack.c.bf16 %v1935_v49, %v1923_v48  ;;  %v4362_v34 = vsub.f32 %v1757_v17, %v2355_v22  ;;  %v1762_v49 = vld [vmem:[#allocation7 + $0x70] sm:$0xff] }
 0x103   :  { %v1925_v38 = vsub.f32 %v1923_v48, %v1924_v20 }
 0x105   :  { %v1926_v4 = vand.u32 4294901760, %v1925_v38 }
 0x107   :  { %v3618_v5 = vpack.c.bf16 %v1938_v6, %v1926_v4 }
 0x108   :  { %3595 = vmatpush1.bf16.xpose.msra.mxu0 %v3594_v55 }
 0x109   :  { %3597 = vmatprep.subr.bf16.mxu0 %v4217_v24  ;;  %v1754_v24 = vld [vmem:[#allocation7 + $0x30] sm:$0xff] }
 0x10a   :  { %v1814_v2 = vand.u32 4294901760, %v1754_v24 }
 0x10c   :  { %v4295_v10 = vpack.c.bf16 %v1814_v2, %v1810_v0 }
 0x10e   :  { %3607 = vmatpush1.bf16.msra.mxu1 %v4295_v10 }
 0x10f   :  { %1662 = vmatmul.mubr.f32.vlgmr.msra.gmra.mrb[0].mxu0 %v4232_v36  ;;  %3609 = vmatprep.subr.bf16.mxu1 %v4306_v32 }
 0x110   :  { %3599 = vmatpush1.bf16.xpose.msra.mxu0 %v4230_v3  ;;  %1740 = vmatprep.mubr.f32.mxu0 %v4207_v54  ;;  %v4291_v3 = vsub.f32 %v1749_v31, %v1808_v28  ;;  %v4293_v54 = vsub.f32 %v1755_v43, %v1812_v59  ;;  %v3640_v31 = vpack.c.bf16 %v1930_v16, %v1918_v58  ;;  %v3459_v28 = vld [vmem:[%s4539_s2] ss:$0 sm:$0xff] }
 0x111   :  { %3601 = vmatprep.subr.bf16.mxu0 %v4238_v11  ;;  %v4299_v11 = vsub.f32 %v1754_v24, %v1814_v2  ;;  %v3642_v43 = vpack.c.bf16 %v1936_v46, %v1924_v20 }
 0x112   :  { %v1894_v26 = vand.u32 4294901760, %v4291_v3  ;;  %v1906_v14 = vand.u32 4294901760, %v4293_v54  ;;  %v3620_v41 = vpack.c.bf16 %v4293_v54, %v4291_v3 }
 0x113   :  { %v1912_v56 = vand.u32 4294901760, %v4299_v11 }
 0x114   :  { %v1895_v40 = vsub.f32 %v4291_v3, %v1894_v26  ;;  %v1907_v50 = vsub.f32 %v4293_v54, %v1906_v14  ;;  %v3636_v55 = vpack.c.bf16 %v1906_v14, %v1894_v26  ;;  %v1756_v26 = vld [vmem:[#allocation7 + $0x40] sm:$0xff]  ;;  %v1763_v14 = vld [vmem:[#allocation7 + $0x78] sm:$0xff] }
 0x115   :  { %v1913_v19 = vsub.f32 %v4299_v11, %v1912_v56 }
 0x116   :  { %v1896_v51 = vand.u32 4294901760, %v1895_v40  ;;  %v1908_v57 = vand.u32 4294901760, %v1907_v50  ;;  %v2359_v40 = vand.u32 4294901760, %v1763_v14  ;;  %v1768_v50 = vld [vmem:[#allocation7 + $0xa0] sm:$0xff] }
 0x117   :  { %v1914_v37 = vand.u32 4294901760, %v1913_v19  ;;  %v2449_v19 = vand.u32 4294901760, %v4362_v34 }
 0x118   :  { %3603 = vmatpush1.bf16.xpose.msra.mxu0 %v3562_v45  ;;  %v4314_v45 = vpack.c.bf16 %v1822_v27, %v1818_v15  ;;  %v3612_v61 = vpack.c.bf16 %v1908_v57, %v1896_v51  ;;  %v1769_v15 = vld [vmem:[#allocation7 + $0xa8] sm:$0xff]  ;;  %v2353_v27 = vand.u32 4294901760, %v1750_v23  ;;  %v2365_v57 = vand.u32 4294901760, %v1768_v50 }
 0x119   :  { %v2363_v48 = vand.u32 4294901760, %v1769_v15  ;;  %v4369_v58 = vsub.f32 %v1763_v14, %v2359_v40 }
 0x11a   :  { %3611 = vmatpush1.bf16.msra.mxu1 %v4314_v45  ;;  %v4364_v51 = vsub.f32 %v1750_v23, %v2353_v27 }
 0x11b   :  { %3613 = vmatprep.subr.bf16.mxu1 %v3612_v61  ;;  %v4371_v16 = vsub.f32 %v1769_v15, %v2363_v48  ;;  %v4382_v61 = vsub.f32 %v1768_v50, %v2365_v57  ;;  %v4397_v42 = vpack.c.bf16 %v2363_v48, %v2359_v40  ;;  %v1765_v40 = vld [vmem:[#allocation7 + $0x88] sm:$0xff]  ;;  %v1771_v48 = vld [vmem:[#allocation7 + $0xb8] sm:$0xff] }
 0x11d   :  { %v2473_v38 = vand.u32 4294901760, %v4371_v16  ;;  %v2479_v4 = vand.u32 4294901760, %v4382_v61 }
 0x11f   :  { %1742 = vmatmul.mubr.f32.vlgmr.msra.gmra.mrb[0].mxu0 %v4232_v36  ;;  %v4297_v36 = vsub.f32 %v1748_v63, %v1810_v0 }
 0x121   :  { %v1900_v30 = vand.u32 4294901760, %v4297_v36  ;;  %v3622_v44 = vpack.c.bf16 %v4299_v11, %v4297_v36 }
 0x123   :  { %v1901_v52 = vsub.f32 %v4297_v36, %v1900_v30 }
 0x125   :  { %v1902_v18 = vand.u32 4294901760, %v1901_v52 }
 0x127   :  { %v3614_v62 = vpack.c.bf16 %v1914_v37, %v1902_v18  ;;  %v2461_v37 = vand.u32 4294901760, %v4369_v58 }
 0x154   :  { %v4287_v1 = vpop.f32.mrb[0].mxu1 }
 0x155   :  { %v469_v8 = vpop.f32.mrb[1].mxu1  ;;  %v3748_v59 = vadd.f32 %v3459_v28, %v4287_v1  ;;  %v1751_v1 = vld [vmem:[#allocation7 + $0x18] sm:$0xff] }
 0x156   :  { %v3638_v8 = vpack.c.bf16 %v1912_v56, %v1900_v30  ;;  %v2351_v21 = vand.u32 4294901760, %v1751_v1  ;;  %v2357_v30 = vand.u32 4294901760, %v1756_v26  ;;  %v2361_v56 = vand.u32 4294901760, %v1762_v49 }
 0x158   :  { %v4360_v33 = vsub.f32 %v1751_v1, %v2351_v21  ;;  %v4366_v52 = vsub.f32 %v1756_v26, %v2357_v30  ;;  %v4376_v20 = vpack.c.bf16 %v2355_v22, %v2351_v21  ;;  %v4380_v46 = vsub.f32 %v1762_v49, %v2361_v56  ;;  %v1753_v21 = vld [vmem:[#allocation7 + $0x28] sm:$0xff]  ;;  %v1759_v22 = vld [vmem:[#allocation7 + $0x58] sm:$0xff] }
 0x159   :  { %v4395_v39 = vpack.c.bf16 %v2357_v30, %v2353_v27  ;;  %v3688_v26 = vpack.c.bf16 %v2473_v38, %v2461_v37  ;;  %v2894_v14 = vand.u32 4294901760, %v1753_v21  ;;  %v2898_v15 = vand.u32 4294901760, %v1759_v22  ;;  %v1752_v27 = vld [vmem:[#allocation7 + $0x20] sm:$0xff]  ;;  %v1758_v30 = vld [vmem:[#allocation7 + $0x50] sm:$0xff] }
 0x15a   :  { %v2437_v18 = vand.u32 4294901760, %v4360_v33  ;;  %v2455_v25 = vand.u32 4294901760, %v4366_v52  ;;  %v3674_v1 = vpack.c.bf16 %v4382_v61, %v4380_v46  ;;  %v2900_v49 = vand.u32 4294901760, %v1758_v30 }
 0x15b   :  { %v4440_v50 = vsub.f32 %v1753_v21, %v2894_v14 }
 0x15c   :  { %v2438_v29 = vsub.f32 %v4360_v33, %v2437_v18  ;;  %v2456_v60 = vsub.f32 %v4366_v52, %v2455_v25  ;;  %v3684_v17 = vpack.c.bf16 %v2449_v19, %v2437_v18  ;;  %v4446_v18 = vsub.f32 %v1758_v30, %v2900_v49 }
 0x15e   :  { %v2439_v6 = vand.u32 4294901760, %v2438_v29 }
 0x1f2   :  { %v1743_v63 = vpop.f32.mrb[0].mxu0 }
 0x1f3   :  { %v3749_v24 = vadd.f32 %v3748_v59, %v1743_v63  ;;  %v1745_v0 = vpop.f32.mrb[1].mxu0 }
 0x1f5   :  { %v1747_v2 = vmax.f32 %v3749_v24, 0.0 }
 0x1f7   :  { %v1806_v3 = vsel %vm1804_vm0, %v1747_v2, 0  ;;  %v3668_v2 = vpack.c.bf16 %v4362_v34, %v4360_v33 }
 0x1f8   :  { %v4336_v54 = vand.u32 4294901760, %v1806_v3 }
 0x1fa   :  { %v4339_v36 = vsub.f32 %v1806_v3, %v4336_v54  ;;  %v3670_v3 = vpack.c.bf16 %v4366_v52, %v4364_v51  ;;  %v2902_v52 = vand.u32 4294901760, %v1765_v40 }
 0x1fc   :  { %v4342_v11 = vand.u32 4294901760, %v4339_v36 }
 0x1fe   :  { %v1884_v12 = vsub.f32 %v4339_v36, %v4342_v11 }
 0x200   :  { %v4346_v13 = vand.u32 4294901760, %v1884_v12  ;;  %v3672_v12 = vpack.c.bf16 %v4371_v16, %v4369_v58 }
 0x202   :  { %1886 = vmatmul.mubr.f32.vlgmr.msra.gmra.mrb[2].mxu1 %v4346_v13 }
 0x203   :  { %3615 = vmatpush1.bf16.msra.mxu1 %v3614_v62  ;;  %1996 = vmatprep.mubr.f32.mxu1 %v3924_v35  ;;  %v2467_v62 = vand.u32 4294901760, %v4380_v46 }
 0x204   :  { %3617 = vmatprep.subr.bf16.mxu1 %v3616_v7 }
 0x205   :  { %v3690_v33 = vpack.c.bf16 %v2479_v4, %v2467_v62 }
 0x207   :  { %3619 = vmatpush1.bf16.msra.mxu1 %v3618_v5  ;;  %v2462_v5 = vsub.f32 %v4369_v58, %v2461_v37  ;;  %v1770_v58 = vld [vmem:[#allocation7 + $0xb0] sm:$0xff] }
 0x208   :  { %3621 = vmatprep.subr.bf16.mxu1 %v3620_v41  ;;  %v2474_v41 = vsub.f32 %v4371_v16, %v2473_v38 }
 0x20a   :  { %1998 = vmatmul.mubr.f32.vlgmr.msra.gmra.mrb[2].mxu1 %v4336_v54 }
 0x20b   :  { %3623 = vmatpush1.bf16.msra.mxu1 %v3622_v44  ;;  %2084 = vmatprep.mubr.f32.mxu1 %v3924_v35  ;;  %v4408_v44 = vpack.c.bf16 %v2365_v57, %v2361_v56  ;;  %v2906_v56 = vand.u32 4294901760, %v1771_v48  ;;  %v1764_v57 = vld [vmem:[#allocation7 + $0x80] sm:$0xff] }
 0x20c   :  { %3625 = vmatprep.subr.bf16.mxu1 %v3624_v47  ;;  %v2457_v47 = vand.u32 4294901760, %v2456_v60 }
 0x20f   :  { %3627 = vmatpush1.bf16.msra.mxu1 %v3626_v53  ;;  %v2468_v53 = vsub.f32 %v4380_v46, %v2467_v62  ;;  %v2908_v46 = vand.u32 4294901760, %v1770_v58 }
 0x210   :  { %3629 = vmatprep.subr.bf16.mxu1 %v4289_v9 }
 0x211   :  { %v2469_v59 = vand.u32 4294901760, %v2468_v53  ;;  %v4462_v38 = vsub.f32 %v1770_v58, %v2908_v46 }
 0x212   :  { %2087 = vmatmul.mubr.f32.vlgmr.msra.gmra.mrb[2].mxu1 %v4339_v36 }
 0x213   :  { %3631 = vmatpush1.bf16.msra.mxu1 %v4295_v10  ;;  %2165 = vmatprep.mubr.f32.mxu1 %v3924_v35 }
 0x214   :  { %3633 = vmatprep.subr.bf16.mxu1 %v4306_v32 }
 0x217   :  { %3635 = vmatpush1.bf16.msra.mxu1 %v4314_v45 }
 0x218   :  { %3637 = vmatprep.subr.bf16.mxu1 %v3636_v55  ;;  %v2480_v55 = vsub.f32 %v4382_v61, %v2479_v4  ;;  %v4449_v61 = vsub.f32 %v1765_v40, %v2902_v52  ;;  %v1772_v40 = vld [vmem:[%s4541_s4] sm:$0x3f]  ;;  %s3925_s4 = smov [#allocation8]  }
 0x219   :  { %s3449_s6 = sshll.u32 %s3925_s4, 4  ;;  %s3450_s6 = int_to_ptr.vmem [resolvable:$true] %s3449_s6 }
 0x21a   :  { %2169 = vmatmul.mubr.f32.vlgmr.msra.gmra.mrb[2].mxu1 %v4342_v11  ;;  %v2481_v63 = vand.u32 4294901760, %v2480_v55  ;;  %v3004_v62 = vand.u32 4294901760, %v4449_v61  ;;  %s3891_s7 = scalar_lea.vmem %s3450_s6, 768  ;;  %p3896_p11 = scmp.lt.s32.totalorder %s3450_s6, %s3450_s6 }
 0x21b   :  { %3639 = vmatpush1.bf16.msra.mxu1 %v3638_v8  ;;  %2263 = vmatprep.mubr.f32.mxu1 %v3924_v35  ;;  %p3892_p10 = scmp.ne.s32.totalorder %s3450_s6, %s3891_s7  ;;  %p3897_p12 = scmp.lt.s32.totalorder %s3891_s7, %s3891_s7 }
 0x21c   :  { %3641 = vmatprep.subr.bf16.mxu1 %v3640_v31  ;;  %v2463_v31 = vand.u32 4294901760, %v2462_v5  ;;  %v3666_v0 = vpack.c.bf16 %v2481_v63, %v2469_v59  ;;  %v3005_v55 = vsub.f32 %v4449_v61, %v3004_v62 }
 0x21d   :  { %p3898_p13 = por %p3897_p12, %p3896_p11 }
 0x21f   :  { %3643 = vmatpush1.bf16.msra.mxu1 %v3642_v43  ;;  %v2475_v43 = vand.u32 4294901760, %v2474_v41  ;;  %p3899_p0 = pnand %p3898_p13, %p3892_p10 }
 0x220   :  { %3645 = vmatprep.subr.bf16.mxu1 %v4289_v9  ;;  %v2443_v9 = vand.u32 4294901760, %v4364_v51 }
 0x221   :  { %v3664_v24 = vpack.c.bf16 %v2475_v43, %v2463_v31 }
 0x222   :  { %2265 = vmatmul.mubr.f32.vlgmr.msra.gmra.mrb[2].mxu1 %v4336_v54  ;;  %v3686_v23 = vpack.c.bf16 %v2455_v25, %v2443_v9  ;;  %v2980_v25 = vand.u32 4294901760, %v4440_v50 }
 0x223   :  { %3647 = vmatpush1.bf16.msra.mxu1 %v4295_v10  ;;  %2343 = vmatprep.mubr.f32.mxu1 %v3924_v35  ;;  %v2450_v10 = vsub.f32 %v4362_v34, %v2449_v19  ;;  %v2896_v34 = vand.u32 4294901760, %v1752_v27  ;;  %v2904_v19 = vand.u32 4294901760, %v1764_v57 }
 0x224   :  { %3649 = vmatprep.subr.bf16.mxu1 %v4306_v32  ;;  %v2444_v32 = vsub.f32 %v4364_v51, %v2443_v9  ;;  %v4442_v51 = vsub.f32 %v1759_v22, %v2898_v15  ;;  %v4451_v9 = vsub.f32 %v1771_v48, %v2906_v56  ;;  %v2981_v60 = vsub.f32 %v4440_v50, %v2980_v25 }
 0x225   :  { %v2451_v7 = vand.u32 4294901760, %v2450_v10  ;;  %v4444_v16 = vsub.f32 %v1752_v27, %v2896_v34  ;;  %v4456_v10 = vpack.c.bf16 %v2898_v15, %v2894_v14  ;;  %v4460_v37 = vsub.f32 %v1764_v57, %v2904_v19 }
 0x226   :  { %v2992_v29 = vand.u32 4294901760, %v4442_v51  ;;  %v3016_v4 = vand.u32 4294901760, %v4451_v9  ;;  %v3706_v31 = vpack.c.bf16 %v2908_v46, %v2904_v19  ;;  %v3716_v21 = vpack.c.bf16 %v4442_v51, %v4440_v50 }
 0x227   :  { %3651 = vmatpush1.bf16.msra.mxu1 %v4314_v45  ;;  %v2445_v45 = vand.u32 4294901760, %v2444_v32  ;;  %v3660_v8 = vpack.c.bf16 %v2451_v7, %v2439_v6  ;;  %v2998_v32 = vand.u32 4294901760, %v4446_v18  ;;  %v4475_v6 = vpack.c.bf16 %v2900_v49, %v2896_v34 }
 0x228   :  { %3653 = vmatprep.subr.bf16.mxu1 %v4376_v20  ;;  %v4477_v7 = vpack.c.bf16 %v2906_v56, %v2902_v52  ;;  %v3010_v41 = vand.u32 4294901760, %v4460_v37  ;;  %v3718_v22 = vpack.c.bf16 %v4446_v18, %v4444_v16  ;;  %v3736_v15 = vpack.c.bf16 %v3016_v4, %v3004_v62 }
 0x229   :  { %v3662_v28 = vpack.c.bf16 %v2457_v47, %v2445_v45  ;;  %v2999_v5 = vsub.f32 %v4446_v18, %v2998_v32  ;;  %v3022_v45 = vand.u32 4294901760, %v4462_v38  ;;  %v2982_v47 = vand.u32 4294901760, %v2981_v60 }
 0x22a   :  { %2345 = vmatmul.mubr.f32.vlgmr.msra.gmra.mrb[2].mxu1 %v4336_v54 }
 0x22b   :  { %3655 = vmatpush1.bf16.msra.mxu1 %v4395_v39  ;;  %2423 = vmatprep.mubr.f32.mxu1 %v3924_v35  ;;  %v3000_v43 = vand.u32 4294901760, %v2999_v5  ;;  %v3023_v59 = vsub.f32 %v4462_v38, %v3022_v45  ;;  %v3738_v27 = vpack.c.bf16 %v3022_v45, %v3010_v41 }
 0x22c   :  { %3657 = vmatprep.subr.bf16.mxu1 %v4397_v42 }
 0x22f   :  { %3659 = vmatpush1.bf16.msra.mxu1 %v4408_v44 }
 0x230   :  { %3661 = vmatprep.subr.bf16.mxu1 %v3660_v8  ;;  %v3017_v8 = vsub.f32 %v4451_v9, %v3016_v4 }
 0x232   :  { %2429 = vmatmul.mubr.f32.vlgmr.msra.gmra.mrb[4].mxu1 %v4346_v13 }
 0x233   :  { %3663 = vmatpush1.bf16.msra.mxu1 %v3662_v28  ;;  %2539 = vmatprep.mubr.f32.mxu1 %v3924_v35  ;;  %v3011_v28 = vsub.f32 %v4460_v37, %v3010_v41 }
 0x234   :  { %3665 = vmatprep.subr.bf16.mxu1 %v3664_v24  ;;  %v3006_v24 = vand.u32 4294901760, %v3005_v55 }
 0x237   :  { %3667 = vmatpush1.bf16.msra.mxu1 %v3666_v0  ;;  %v3018_v0 = vand.u32 4294901760, %v3017_v8 }
 0x238   :  { %3669 = vmatprep.subr.bf16.mxu1 %v3668_v2 }
 0x23a   :  { %2541 = vmatmul.mubr.f32.vlgmr.msra.gmra.mrb[4].mxu1 %v4336_v54 }
 0x23b   :  { %3671 = vmatpush1.bf16.msra.mxu1 %v3670_v3  ;;  %2627 = vmatprep.mubr.f32.mxu1 %v3924_v35  ;;  %v3012_v3 = vand.u32 4294901760, %v3011_v28 }
 0x23c   :  { %3673 = vmatprep.subr.bf16.mxu1 %v3672_v12  ;;  %v3024_v12 = vand.u32 4294901760, %v3023_v59 }
 0x23f   :  { %3675 = vmatpush1.bf16.msra.mxu1 %v3674_v1  ;;  %v3712_v1 = vpack.c.bf16 %v3018_v0, %v3006_v24 }
 0x240   :  { %3677 = vmatprep.subr.bf16.mxu1 %v4376_v20 }
 0x242   :  { %2630 = vmatmul.mubr.f32.vlgmr.msra.gmra.mrb[4].mxu1 %v4339_v36 }
 0x243   :  { %3679 = vmatpush1.bf16.msra.mxu1 %v4395_v39  ;;  %2708 = vmatprep.mubr.f32.mxu1 %v3924_v35 }
 0x244   :  { %3681 = vmatprep.subr.bf16.mxu1 %v4397_v42 }
 0x247   :  { %3683 = vmatpush1.bf16.msra.mxu1 %v4408_v44 }
 0x248   :  { %3685 = vmatprep.subr.bf16.mxu1 %v3684_v17  ;;  %v3714_v17 = vpack.c.bf16 %v3024_v12, %v3012_v3 }
 0x24a   :  { %2712 = vmatmul.mubr.f32.vlgmr.msra.gmra.mrb[4].mxu1 %v4342_v11 }
 0x24b   :  { %3687 = vmatpush1.bf16.msra.mxu1 %v3686_v23  ;;  %2806 = vmatprep.mubr.f32.mxu1 %v3924_v35  ;;  %v3720_v23 = vpack.c.bf16 %v4451_v9, %v4449_v61 }
 0x24c   :  { %3689 = vmatprep.subr.bf16.mxu1 %v3688_v26  ;;  %v3732_v26 = vpack.c.bf16 %v2992_v29, %v2980_v25 }
 0x24f   :  { %3691 = vmatpush1.bf16.msra.mxu1 %v3690_v33 }
 0x250   :  { %3693 = vmatprep.subr.bf16.mxu1 %v4376_v20  ;;  %v2986_v20 = vand.u32 4294901760, %v4444_v16 }
 0x252   :  { %2808 = vmatmul.mubr.f32.vlgmr.msra.gmra.mrb[4].mxu1 %v4336_v54  ;;  %v3734_v14 = vpack.c.bf16 %v2998_v32, %v2986_v20 }
 0x253   :  { %3695 = vmatpush1.bf16.msra.mxu1 %v4395_v39  ;;  %2886 = vmatprep.mubr.f32.mxu1 %v3924_v35  ;;  %v2993_v39 = vsub.f32 %v4442_v51, %v2992_v29 }
 0x254   :  { %3697 = vmatprep.subr.bf16.mxu1 %v4397_v42  ;;  %v2987_v42 = vsub.f32 %v4444_v16, %v2986_v20 }
 0x255   :  { %v2994_v53 = vand.u32 4294901760, %v2993_v39 }
 0x257   :  { %3699 = vmatpush1.bf16.msra.mxu1 %v4408_v44  ;;  %v2988_v44 = vand.u32 4294901760, %v2987_v42  ;;  %v3708_v63 = vpack.c.bf16 %v2994_v53, %v2982_v47 }
 0x258   :  { %3701 = vmatprep.subr.bf16.mxu1 %v4456_v10 }
 0x259   :  { %v3710_v2 = vpack.c.bf16 %v3000_v43, %v2988_v44 }
 0x25a   :  { %2888 = vmatmul.mubr.f32.vlgmr.msra.gmra.mrb[4].mxu1 %v4336_v54 }
 0x25b   :  { %3703 = vmatpush1.bf16.msra.mxu1 %v4475_v6  ;;  %2966 = vmatprep.mubr.f32.mxu1 %v3924_v35 }
 0x25c   :  { %3705 = vmatprep.subr.bf16.mxu1 %v4477_v7 }
 0x25f   :  { %3707 = vmatpush1.bf16.msra.mxu1 %v3706_v31 }
 0x260   :  { %3709 = vmatprep.subr.bf16.mxu1 %v3708_v63 }
 0x262   :  { %2972 = vmatmul.mubr.f32.vlgmr.msra.gmra.mrb[6].mxu1 %v4346_v13  ;;  %v3722_v13 = vpack.c.bf16 %v4462_v38, %v4460_v37 }
 0x263   :  { %3711 = vmatpush1.bf16.msra.mxu1 %v3710_v2  ;;  %3082 = vmatprep.mubr.f32.mxu1 %v3924_v35 }
 0x264   :  { %3713 = vmatprep.subr.bf16.mxu1 %v3712_v1 }
 0x267   :  { %3715 = vmatpush1.bf16.msra.mxu1 %v3714_v17 }
 0x268   :  { %3717 = vmatprep.subr.bf16.mxu1 %v3716_v21 }
 0x26a   :  { %3084 = vmatmul.mubr.f32.vlgmr.msra.gmra.mrb[6].mxu1 %v4336_v54 }
 0x26b   :  { %3719 = vmatpush1.bf16.msra.mxu1 %v3718_v22  ;;  %3170 = vmatprep.mubr.f32.mxu1 %v3924_v35 }
 0x26c   :  { %3721 = vmatprep.subr.bf16.mxu1 %v3720_v23 }
 0x26f   :  { %3723 = vmatpush1.bf16.msra.mxu1 %v3722_v13 }
 0x270   :  { %3725 = vmatprep.subr.bf16.mxu1 %v4456_v10 }
 0x272   :  { %3173 = vmatmul.mubr.f32.vlgmr.msra.gmra.mrb[6].mxu1 %v4339_v36  ;;  %v1774_v36 = vlaneseq }
 0x273   :  { %3727 = vmatpush1.bf16.msra.mxu1 %v4475_v6  ;;  %3251 = vmatprep.mubr.f32.mxu1 %v3924_v35 }
 0x274   :  { %3729 = vmatprep.subr.bf16.mxu1 %v4477_v7 }
 0x277   :  { %3731 = vmatpush1.bf16.msra.mxu1 %v3706_v31 }
 0x278   :  { %3733 = vmatprep.subr.bf16.mxu1 %v3732_v26 }
 0x27a   :  { %3255 = vmatmul.mubr.f32.vlgmr.msra.gmra.mrb[6].mxu1 %v4342_v11  ;;  %v1775_v11 = vshrl.u32 %v1774_v36, 7 }
 0x27b   :  { %3735 = vmatpush1.bf16.msra.mxu1 %v3734_v14  ;;  %3349 = vmatprep.mubr.f32.mxu1 %v3924_v35 }
 0x27c   :  { %3737 = vmatprep.subr.bf16.mxu1 %v3736_v15  ;;  %v1776_v30 = vsub.s32 0, %v1775_v11  ;;  %v1780_v48 = vsub.s32 1, %v1775_v11  ;;  %v1788_v56 = vsub.s32 3, %v1775_v11  ;;  %v1792_v46 = vsub.s32 4, %v1775_v11 }
 0x27d   :  { %v1796_v61 = vsub.s32 5, %v1775_v11 }
 0x27e   :  { %v1777_v33 = vrot.slane %v1772_v40, %v1776_v30  ;;  %v1781_v34 = vrot.slane %v1772_v40, %v1780_v48  ;;  %v1793_v9 = vrot.slane %v1772_v40, %v1792_v46 }
 0x27f   :  { %3739 = vmatpush1.bf16.msra.mxu1 %v3738_v27  ;;  %v1797_v25 = vrot.slane %v1772_v40, %v1796_v61 }
 0x280   :  { %3741 = vmatprep.subr.bf16.mxu1 %v4456_v10 }
 0x282   :  { %3351 = vmatmul.mubr.f32.vlgmr.msra.gmra.mrb[6].mxu1 %v4336_v54 }
 0x283   :  { %3743 = vmatpush1.bf16.msra.mxu1 %v4475_v6  ;;  %3429 = vmatprep.mubr.f32.mxu1 %v3924_v35  ;;  %v1784_v35 = vsub.s32 2, %v1775_v11 }
 0x284   :  { %3745 = vmatprep.subr.bf16.mxu1 %v4477_v7 }
 0x285   :  { %v1785_v57 = vrot.slane %v1772_v40, %v1784_v35 }
 0x287   :  { %3747 = vmatpush1.bf16.msra.mxu1 %v3706_v31 }
 0x28a   :  { %3431 = vmatmul.mubr.f32.vlgmr.msra.gmra.mrb[6].mxu1 %v4336_v54  ;;  %v1789_v54 = vrot.slane %v1772_v40, %v1788_v56 }
 0x2fd   :  { %v2346_v49 = vpop.f32.mrb[2].mxu1 }
 0x2fe   :  { %v3750_v50 = vadd.f32 %v2346_v49, %v1777_v33  ;;  %v2348_v51 = vpop.f32.mrb[3].mxu1 }
 0x2ff   :  { %v3751_v52 = vadd.f32 %v2348_v51, %v1781_v34 }
 0x300   :  { %3437 = vst [vmem:[#allocation8] sm:$0xff] %v3750_v50 }
 0x301   :  { %3438 = vst [vmem:[#allocation8 + $0x8] sm:$0xff] %v3751_v52 }
 0x32d   :  { %v2889_v58 = vpop.f32.mrb[4].mxu1 }
 0x32e   :  { %v3752_v16 = vadd.f32 %v2889_v58, %v1785_v57  ;;  %v2891_v18 = vpop.f32.mrb[5].mxu1 }
 0x32f   :  { %v3753_v19 = vadd.f32 %v2891_v18, %v1789_v54 }
 0x330   :  { %3439 = vst [vmem:[#allocation8 + $0x10] sm:$0xff] %v3752_v16 }
 0x331   :  { %3440 = vst [vmem:[#allocation8 + $0x18] sm:$0xff] %v3753_v19 }
 0x35d   :  { %v3432_v29 = vpop.f32.mrb[6].mxu1 }
 0x35e   :  { %v3754_v10 = vadd.f32 %v3432_v29, %v1793_v9  ;;  %v3434_v37 = vpop.f32.mrb[7].mxu1 }
 0x35f   :  { %v3755_v38 = vadd.f32 %v3434_v37, %v1797_v25 }
 0x360   :  { %3441 = vst [vmem:[#allocation8 + $0x20] sm:$0xff] %v3754_v10 }
 0x361   :  { %3442 = vst [vmem:[#allocation8 + $0x28] sm:$0xff] %v3755_v38 }
 0x362   :  { %3902 = shalt.err (!%p3899_p0)
}
 0x363   :  { %s3903_s10 = scalar_lea.hbm %s4542_s5, 768 }
 0x364   :  { %p3904_p1 = scmp.ne.s32.totalorder %s4542_s5, %s3903_s10  ;;  %p3907_p2 = scmp.lt.u32.totalorder %s3903_s10, %s4542_s5 }
 0x366   :  { %p3909_p3 = pnand %p3907_p2, %p3904_p1 }
 0x368   :  { %3912 = shalt.err (!%p3909_p3)
}
 0x369   :  { %3452 = dma.vmem_to_hbm [thread:$0]  %s3450_s6, 768, %s4542_s5, [#allocation4]  }
 0x36a   :  { %3917 = dma.done.wait [#allocation4], 768  }
 0x36b   :  { %3918 = vsyncadd [#allocation4], 4294966528 }
 0x36c   :  { %3456 = vsyncpa [#allocation3], 1 }
 0x36d   :  { %3457 = vsyncpa [#allocation6], 1 }
 0x36e   :  { %3458 = vsyncpa [#allocation4], 1 }

</bundles_post_ra>
